<compile_context>
chip_gen: v7x
topology: tpu7x:2x2x1
jax: 0.10.0
libtpu: 0.0.40
codegen_flags: <defaults>
</compile_context>

<pallas_src>
import functools

import jax
import jax.numpy as jnp
from jax.experimental import pallas as pl
from jax.experimental.pallas import tpu as pltpu


def _sep_conv_kernel(x_ref, w_ref, b_ref, o_ref, *, use_mxu):
    # x_ref: [1, Cin, tl]   activation tile (channels on sublane, pixels on lane)
    # w_ref: [Cout, Cin]    fully-folded pointwise weight
    # b_ref: [Cout, 1]      fully-folded bias
    # o_ref: [1, Cout, tl]  output tile (lane-dense)
    x = x_ref[0].astype(jnp.float32)          # [Cin, tl]
    w = w_ref[...]                            # [Cout, Cin]
    b = b_ref[...]                            # [Cout, 1]
    cout, cin = w.shape
    tl = x.shape[-1]
    if use_mxu:
        z = jnp.dot(w, x, preferred_element_type=jnp.float32) + b
    else:
        # Tiny channel counts: unrolled VPU outer-product accumulation; the MXU
        # would be <1% utilized and only add push/pop latency to the per-tile path.
        z = jnp.broadcast_to(b, (cout, tl))
        for c in range(cin):                  # static unroll, cin <= 16 here
            z = z + w[:, c:c + 1] * x[c:c + 1, :]
    o_ref[0] = jnp.maximum(z, 0.0).astype(o_ref.dtype)


def _choose_spatial_tile(hw, cin, cout, *, budget_bytes=8 * 1024 * 1024):
    """Largest lane (spatial) tile that keeps double-buffered f32 tiles under budget."""
    per_col = 2 * 4 * (cin + cout)            # double-buffered input + output, f32
    cap = max(128, budget_bytes // per_col)
    if hw <= cap:
        return hw, hw                         # whole spatial row per step, no padding
    if hw % 128 == 0:
        t = min((cap // 128) * 128, hw)
        while t >= 128:
            if hw % t == 0:
                return t, hw                  # 128-multiple divisor, no padding
            t -= 128
    t = (cap // 128) * 128                    # rare fallback: pad the lane axis
    return t, pl.cdiv(hw, t) * t


def separable_conv_bn_relu(x_nchw, params, *, bn_eps=1e-5,
                           vmem_budget_bytes=8 * 1024 * 1024):
    """x_nchw: [N, Cin, H, W] float32. Returns [N, Cout, H, W] (eval-mode BN)."""
    N, Cin, H, W = x_nchw.shape
    w_dw = params["dw_weight"]                # [Cin, 1, 1, 1] depthwise conv (k=1)
    g1, b1, m1, v1 = params["bn1"]            # each [Cin]
    w_pw = params["pw_weight"]                # [Cout, Cin, 1, 1]
    g2, b2, m2, v2 = params["bn2"]            # each [Cout]
    Cout = w_pw.shape[0]

    # ---- fold everything into a single matmul + bias (tiny plain-JAX glue) ----
    #   y = x * s1 + bias1  (depthwise scale + BN1)
    #   z = W_pw @ y ; out = relu(z * inv2 + bias2)  ==>  relu(W' @ x + b')
    inv1 = g1 / jnp.sqrt(v1 + bn_eps)
    s1 = w_dw.reshape(Cin) * inv1
    bias1 = b1 - m1 * inv1
    inv2 = g2 / jnp.sqrt(v2 + bn_eps)
    w2 = w_pw.reshape(Cout, Cin)
    w_fold = ((inv2[:, None] * w2) * s1[None, :]).astype(jnp.float32)   # [Cout, Cin]
    # elementwise-mul + reduce (avoids reduced-precision host matmul)
    b_fold = (inv2 * jnp.sum(w2 * bias1[None, :], axis=1)
              + (b2 - m2 * inv2)).reshape(Cout, 1).astype(jnp.float32)  # [Cout, 1]

    # ---- NCHW-native layout: [N, Cin, H*W]; channels on sublane, pixels on lane ----
    HW = H * W
    tl, hw_pad = _choose_spatial_tile(HW, Cin, Cout, budget_bytes=vmem_budget_bytes)
    x3 = x_nchw.reshape(N, Cin, HW)
    if hw_pad != HW:
        x3 = jnp.pad(x3, ((0, 0), (0, 0), (0, hw_pad - HW)))

    grid = (N, hw_pad // tl)
    kernel = functools.partial(_sep_conv_kernel, use_mxu=Cin > 16)

    out3 = pl.pallas_call(
        kernel,
        out_shape=jax.ShapeDtypeStruct((N, Cout, hw_pad), x_nchw.dtype),
        grid_spec=pltpu.PrefetchScalarGridSpec(
            num_scalar_prefetch=0,
            grid=grid,
            in_specs=[
                pl.BlockSpec((1, Cin, tl), lambda n, j: (n, 0, j)),   # activations
                pl.BlockSpec((Cout, Cin), lambda n, j: (0, 0)),       # folded weight
                pl.BlockSpec((Cout, 1), lambda n, j: (0, 0)),         # folded bias
            ],
            out_specs=pl.BlockSpec((1, Cout, tl), lambda n, j: (n, 0, j)),
        ),
        compiler_params=pltpu.CompilerParams(
            dimension_semantics=("parallel", "parallel")),
    )(x3, w_fold, b_fold)

    if hw_pad != HW:
        out3 = out3[:, :, :HW]
    return out3.reshape(N, Cout, H, W)


def _reference(x_nchw, params, bn_eps=1e-5):
    """Pure-JAX reference matching PyTorch eval-mode semantics."""
    N, Cin, H, W = x_nchw.shape
    w_dw = params["dw_weight"].reshape(1, Cin, 1, 1)
    g1, b1, m1, v1 = params["bn1"]
    w_pw = params["pw_weight"]
    g2, b2, m2, v2 = params["bn2"]
    Cout = w_pw.shape[0]
    y = x_nchw * w_dw
    y = (y - m1.reshape(1, Cin, 1, 1)) / jnp.sqrt(v1.reshape(1, Cin, 1, 1) + bn_eps)
    y = y * g1.reshape(1, Cin, 1, 1) + b1.reshape(1, Cin, 1, 1)
    z = jnp.einsum("nchw,oc->nohw", y, w_pw.reshape(Cout, Cin),
                   precision=jax.lax.Precision.HIGHEST)
    z = (z - m2.reshape(1, Cout, 1, 1)) / jnp.sqrt(v2.reshape(1, Cout, 1, 1) + bn_eps)
    z = z * g2.reshape(1, Cout, 1, 1) + b2.reshape(1, Cout, 1, 1)
    return jnp.maximum(z, 0.0)


def _make_params(key, cin, cout):
    ks = jax.random.split(key, 10)
    return {
        "dw_weight": jax.random.normal(ks[0], (cin, 1, 1, 1), dtype=jnp.float32),
        "pw_weight": jax.random.normal(ks[1], (cout, cin, 1, 1), dtype=jnp.float32) * 0.5,
        "bn1": (
            1.0 + 0.1 * jax.random.normal(ks[2], (cin,), dtype=jnp.float32),
            0.1 * jax.random.normal(ks[3], (cin,), dtype=jnp.float32),
            0.1 * jax.random.normal(ks[4], (cin,), dtype=jnp.float32),
            jnp.abs(jax.random.normal(ks[5], (cin,), dtype=jnp.float32)) + 0.5,
        ),
        "bn2": (
            1.0 + 0.1 * jax.random.normal(ks[6], (cout,), dtype=jnp.float32),
            0.1 * jax.random.normal(ks[7], (cout,), dtype=jnp.float32),
            0.1 * jax.random.normal(ks[8], (cout,), dtype=jnp.float32),
            jnp.abs(jax.random.normal(ks[9], (cout,), dtype=jnp.float32)) + 0.5,
        ),
    }


if __name__ == "__main__":
    root = jax.random.PRNGKey(0)
    k1, k2, k3, k4 = jax.random.split(root, 4)

    # Case 1: tiny channels (Cin=4 -> Cout=8) -> unrolled VPU contraction path.
    N, Cin, Cout, H, W = 2, 4, 8, 16, 16
    x = jax.random.normal(k1, (N, Cin, H, W), dtype=jnp.float32)
    params = _make_params(k2, Cin, Cout)
    out = jax.block_until_ready(separable_conv_bn_relu(x, params))
    ref = _reference(x, params)
    assert out.shape == (N, Cout, H, W), out.shape
    assert jnp.allclose(out, ref, atol=1e-4, rtol=1e-4), float(
        jnp.max(jnp.abs(out - ref)))

    # Case 2: larger channels (Cin=32 -> Cout=48) -> MXU matmul path.
    N2, Cin2, Cout2, H2, W2 = 1, 32, 48, 16, 16
    x2 = jax.random.normal(k3, (N2, Cin2, H2, W2), dtype=jnp.float32)
    params2 = _make_params(k4, Cin2, Cout2)
    out2 = jax.block_until_ready(separable_conv_bn_relu(x2, params2))
    ref2 = _reference(x2, params2)
    assert out2.shape == (N2, Cout2, H2, W2), out2.shape
    assert jnp.allclose(out2, ref2, atol=1e-4, rtol=1e-4), float(
        jnp.max(jnp.abs(out2 - ref2)))

    print("KERNEL_OK")
</pallas_src>

<mosaic_0001>
module attributes {stable_mosaic.version = 11 : i64} {
  func.func @_sep_conv_kernel(%arg0: i32, %arg1: i32, %arg2: memref<1x4x256xf32, #tpu.memory_space<vmem>>, %arg3: memref<8x4xf32, #tpu.memory_space<vmem>>, %arg4: memref<8x1xf32, #tpu.memory_space<vmem>>, %arg5: memref<1x8x256xf32, #tpu.memory_space<vmem>>) attributes {dimension_semantics = [#tpu.dimension_semantics<parallel>, #tpu.dimension_semantics<parallel>], iteration_bounds = array<i64: 2, 1>, scalar_prefetch = 0 : i64, scratch_operands = 0 : i64, tpu.core_type = #tpu.core_type<tc>, window_params = [{transform_indices = @transform_0, window_bounds = array<i64: 1, 4, 256>}, {pipeline_mode = #tpu.pipeline_mode<synchronous>, transform_indices = @transform_1, window_bounds = array<i64: 8, 4>}, {pipeline_mode = #tpu.pipeline_mode<synchronous>, transform_indices = @transform_2, window_bounds = array<i64: 8, 1>}, {transform_indices = @transform_3, window_bounds = array<i64: 1, 8, 256>}]} {
    %c0 = arith.constant 0 : index
    %c0_0 = arith.constant 0 : index
    %c0_1 = arith.constant 0 : index
    %0 = vector.load %arg2[%c0, %c0_0, %c0_1] : memref<1x4x256xf32, #tpu.memory_space<vmem>>, vector<1x4x256xf32>
    %1 = vector.shape_cast %0 : vector<1x4x256xf32> to vector<4x256xf32>
    %c0_2 = arith.constant 0 : index
    %c0_3 = arith.constant 0 : index
    %2 = vector.load %arg3[%c0_2, %c0_3] : memref<8x4xf32, #tpu.memory_space<vmem>>, vector<8x4xf32>
    %c0_4 = arith.constant 0 : index
    %c0_5 = arith.constant 0 : index
    %3 = vector.load %arg4[%c0_4, %c0_5] : memref<8x1xf32, #tpu.memory_space<vmem>>, vector<8x1xf32>
    %4 = vector.shape_cast %3 : vector<8x1xf32> to vector<8x1xf32>
    %5 = vector.broadcast %4 : vector<8x1xf32> to vector<8x256xf32>
    %6 = vector.extract_strided_slice %2 {offsets = [0, 0], sizes = [8, 1], strides = [1, 1]} : vector<8x4xf32> to vector<8x1xf32>
    %7 = vector.extract_strided_slice %1 {offsets = [0, 0], sizes = [1, 256], strides = [1, 1]} : vector<4x256xf32> to vector<1x256xf32>
    %8 = vector.broadcast %6 : vector<8x1xf32> to vector<8x256xf32>
    %9 = vector.broadcast %7 : vector<1x256xf32> to vector<8x256xf32>
    %10 = arith.mulf %8, %9 : vector<8x256xf32>
    %11 = arith.addf %5, %10 : vector<8x256xf32>
    %12 = vector.extract_strided_slice %2 {offsets = [0, 1], sizes = [8, 1], strides = [1, 1]} : vector<8x4xf32> to vector<8x1xf32>
    %13 = vector.extract_strided_slice %1 {offsets = [1, 0], sizes = [1, 256], strides = [1, 1]} : vector<4x256xf32> to vector<1x256xf32>
    %14 = vector.broadcast %12 : vector<8x1xf32> to vector<8x256xf32>
    %15 = vector.broadcast %13 : vector<1x256xf32> to vector<8x256xf32>
    %16 = arith.mulf %14, %15 : vector<8x256xf32>
    %17 = arith.addf %11, %16 : vector<8x256xf32>
    %18 = vector.extract_strided_slice %2 {offsets = [0, 2], sizes = [8, 1], strides = [1, 1]} : vector<8x4xf32> to vector<8x1xf32>
    %19 = vector.extract_strided_slice %1 {offsets = [2, 0], sizes = [1, 256], strides = [1, 1]} : vector<4x256xf32> to vector<1x256xf32>
    %20 = vector.broadcast %18 : vector<8x1xf32> to vector<8x256xf32>
    %21 = vector.broadcast %19 : vector<1x256xf32> to vector<8x256xf32>
    %22 = arith.mulf %20, %21 : vector<8x256xf32>
    %23 = arith.addf %17, %22 : vector<8x256xf32>
    %24 = vector.extract_strided_slice %2 {offsets = [0, 3], sizes = [8, 1], strides = [1, 1]} : vector<8x4xf32> to vector<8x1xf32>
    %25 = vector.extract_strided_slice %1 {offsets = [3, 0], sizes = [1, 256], strides = [1, 1]} : vector<4x256xf32> to vector<1x256xf32>
    %26 = vector.broadcast %24 : vector<8x1xf32> to vector<8x256xf32>
    %27 = vector.broadcast %25 : vector<1x256xf32> to vector<8x256xf32>
    %28 = arith.mulf %26, %27 : vector<8x256xf32>
    %29 = arith.addf %23, %28 : vector<8x256xf32>
    %cst = arith.constant 0.000000e+00 : f32
    %30 = vector.broadcast %cst : f32 to vector<8x256xf32>
    %31 = arith.maximumf %29, %30 : vector<8x256xf32>
    %c0_6 = arith.constant 0 : index
    %c0_7 = arith.constant 0 : index
    %c0_8 = arith.constant 0 : index
    %32 = vector.load %arg5[%c0_6, %c0_7, %c0_8] : memref<1x8x256xf32, #tpu.memory_space<vmem>>, vector<1x8x256xf32>
    %33 = vector.shape_cast %32 : vector<1x8x256xf32> to vector<8x256xf32>
    %34 = vector.shape_cast %31 : vector<8x256xf32> to vector<1x8x256xf32>
    tpu.vector_store %arg5[%c0_6, %c0_7, %c0_8], %34 {strides = array<i32>} : memref<1x8x256xf32, #tpu.memory_space<vmem>>, vector<1x8x256xf32>,
    return
  }
  func.func @transform_0(%arg0: i32, %arg1: i32) -> (i32, i32, i32) {
    %c0_i32 = arith.constant 0 : i32
    %c0_i32_0 = arith.constant 0 : i32
    return %arg0, %c0_i32, %arg1 : i32, i32, i32
  }
  func.func @transform_1(%arg0: i32, %arg1: i32) -> (i32, i32) {
    %c0_i32 = arith.constant 0 : i32
    %c0_i32_0 = arith.constant 0 : i32
    %c0_i32_1 = arith.constant 0 : i32
    return %c0_i32, %c0_i32_0 : i32, i32
  }
  func.func @transform_2(%arg0: i32, %arg1: i32) -> (i32, i32) {
    %c0_i32 = arith.constant 0 : i32
    %c0_i32_0 = arith.constant 0 : i32
    %c0_i32_1 = arith.constant 0 : i32
    return %c0_i32, %c0_i32_0 : i32, i32
  }
  func.func @transform_3(%arg0: i32, %arg1: i32) -> (i32, i32, i32) {
    %c0_i32 = arith.constant 0 : i32
    %c0_i32_0 = arith.constant 0 : i32
    return %arg0, %c0_i32, %arg1 : i32, i32, i32
  }
}

</mosaic_0001>

<bundles_post_ra>
// kernel: tpu_custom_call.1
= control target key start
LH: loop header
LB: loop body
LE: loop exit
PB: predicated region body
PF: predicated region fallthrough
CT: control target
= control target key end

     0   :  { %8 = vsyncpa [#allocation3], 0  ;;  %s716_s0 = inlined_call_operand.vmem [shape: f32[2,4,256], index: 0, kind: input, shape index: {}]   ;;  %s717_s1 = inlined_call_operand.vmem [shape: f32[8,4], index: 1, kind: input, shape index: {}]   ;;  %s718_s2 = inlined_call_operand.vmem [shape: f32[8,1], index: 2, kind: input, shape index: {}]   ;;  %s719_s3 = inlined_call_operand.hbm [shape: f32[2,8,256], index: 3, kind: output, shape index: {}]  }
   0x1   :  { %10 = vsyncpa [#allocation3 + $0x1], 0  ;;  %s594_s12 = smov 0   ;;  %s596_s13 = smov 0  }
   0x2   :  { %s598_s14 = smov 0   ;;  %s600_s15 = smov 0  }
   0x3   :  { %s602_s16 = smov 0   ;;  %s604_s17 = smov 0  }
   0x4 LB: > { %s411_s18 = sadd.s32 4294967295, %s567_s17   ;;  %s412_s19 = sadd.s32 4294967294, %s567_s17   ;;  %s567_s17 = sphi %s604_s17, %s16_s17   ;;  %s563_s16 = sphi %s602_s16, %s726_s16   ;;  %s559_s15 = sphi %s600_s15, %s725_s15   ;;  %s555_s14 = sphi %s598_s14, %s724_s14   ;;  %s551_s13 = sphi %s596_s13, %s723_s13   ;;  %s547_s12 = sphi %s594_s12, %s722_s12  }
   0x5   : > { %s28_s20 = sadd.s32 1, %s563_s16  ;;  %s107_s21 = sadd.s32 1, %s555_s14 }
   0x6   : > { %p30_p0 = scmp.ge.s32.totalorder %s28_s20, 2  ;;  %p117_p1 = scmp.ne.s32.totalorder %s555_s14, %s551_s13 }
   0x7   : > { %p118_p2 = scmp.eq.s32.totalorder %s411_s18, 1  ;;  %p123_p3 = scmp.ne.s32.totalorder %s551_s13, %s547_s12 }
   0x8   : > { %s728_s20 = smov (%p30_p0, %s28_s20), 0  ;;  %p124_p5 = scmp.eq.s32.totalorder %s412_s19, 1 }
   0x9   : > { %p634_p4 = por %p118_p2, %p117_p1  ;;  %s102_s23 = ssub.s32 %s563_s16, %s728_s20 }
   0xa   : > { %p415_p6 = scmp.ge.s32.totalorder %s567_s17, 1  ;;  %p105_p7 = scmp.eq.s32.totalorder %s102_s23, 0 }
   0xb   : > { %p641_p8 = por %p124_p5, %p123_p3  ;;  %p161_p9 = scmp.lt.s32.totalorder %s567_s17, 3 }
   0xc   : > { %s647_s25 = scalar_select %p105_p7, %s555_s14, %s107_s21  }
   0xd   : > { %p162_p10 = pnand %p415_p6, %p161_p9 }
   0xe   : > { %v201_v0 = vld [vmem:[%s717_s1] sm:$0xff] (!%p162_p10)  ;;  %v569_v1 = vmov (!%p162_p10), 0   ;;  %v570_v2 = vmov (!%p162_p10), 1   ;;  %v571_v4 = vmov (!%p162_p10), 2   ;;  %v572_v5 = vmov (!%p162_p10), 3   ;;  %p190_p11 = scmp.lt.s32.totalorder (!%p162_p10), %s559_s15, 1 }
   0xf   : > { %165 = sbr.rel (%p162_p10) target bundleno = 173 (0xad), region = 32  ;;  %485 = vset.pattern.permute.xlu0 (!%p162_p10), %v569_v1  ;;  %486 = vset.pattern.permute.xlu1 (!%p162_p10), %v570_v2  ;;  %v202_v3 = vld [vmem:[%s718_s2] sm:$0xff] (!%p162_p10)  ;;  %v214_v6 = vlaneseq (!%p162_p10)  ;;  %s186_s8 = sand.u32 (!%p162_p10), 1, %s551_s13  }
  0x10   : > { %210 = vperm.xlu0 (!%p162_p10), %485, %v201_v0   ;;  %237 = vperm.xlu1 (!%p162_p10), %486, %v201_v0   ;;  %s416_s9 = sshll.u32 (!%p162_p10), %s186_s8, 4  ;;  %s425_s10 = sshll.u32 (!%p162_p10), %s559_s15, 8 }
  0x11   : > { %v215_v7 = vshrl.u32 (!%p162_p10), %v214_v6, 7  ;;  %s188_s11 = scalar_lea.vmem (!%p162_p10), [#allocation2], %s416_s9  ;;  %s667_s23 = scalar_lea.hbm (!%p162_p10), %s719_s3, %s425_s10 }
  0x12   : > { %s335_s18 = sshll.u32 (!%p162_p10), %s188_s11, 4  ;;  %s573_s27 = smov (!%p162_p10), [#allocation2]   ;;  %s669_s18 = int_to_ptr.vmem [resolvable:$true] %s335_s18 }
  0x13   : > { %v216_v8 = vsub.s32 (!%p162_p10), 0, %v215_v7  ;;  %v220_v9 = vsub.s32 (!%p162_p10), 4, %v215_v7  ;;  %v242_v11 = vsub.s32 (!%p162_p10), 1, %v215_v7  ;;  %v246_v12 = vsub.s32 (!%p162_p10), 5, %v215_v7  ;;  %s489_s26 = scalar_lea.vmem (!%p162_p10), %s669_s18, 256  ;;  %s493_s28 = sshll.u32 (!%p162_p10), %s573_s27, 4  ;;  %s494_s28 = int_to_ptr.vmem [resolvable:$false] %s493_s28 }
  0x14   : > { %205 = vperm.xlu0 (!%p162_p10), %485, %v202_v3   ;;  %487 = vset.pattern.permute.xlu1 (!%p162_p10), %v571_v4  ;;  %v268_v13 = vsub.s32 (!%p162_p10), 2, %v215_v7  ;;  %v272_v14 = vsub.s32 (!%p162_p10), 6, %v215_v7  ;;  %v294_v21 = vsub.s32 (!%p162_p10), 3, %v215_v7  ;;  %v298_v22 = vsub.s32 (!%p162_p10), 7, %v215_v7  ;;  %p490_p12 = scmp.ne.s32.totalorder (!%p162_p10), %s669_s18, %s489_s26  ;;  %s495_s29 = scalar_lea.vmem (!%p162_p10), %s494_s28, 512 }
  0x15   : > { %263 = vperm.xlu1 (!%p162_p10), %487, %v201_v0   ;;  %p496_p1 = scmp.lt.s32.totalorder (!%p162_p10), %s669_s18, %s494_s28  ;;  %p497_p2 = scmp.lt.s32.totalorder (!%p162_p10), %s495_s29, %s489_s26 }
  0x16   : > { %s191_s30 = scalar_select %p190_p11, %s559_s15, 1 }
  0x17   : > { %s319_s15 = scalar_lea.sflag [#allocation3], %s186_s8  ;;  %p491_p13 = pnand %p490_p12, %p634_p4 }
  0x18   : > { %488 = vset.pattern.permute.xlu0 %v572_v5  ;;  %s424_s4 = sshll.u32 %s191_s30, 3  ;;  %p498_p3 = por %p497_p2, %p496_p1 }
  0x19   : > { %289 = vperm.xlu0 %488, %v201_v0   ;;  %s197_s7 = scalar_lea.vmem %s716_s0, %s424_s4  ;;  %p492_p0 = pneg %p491_p13 }
  0x1a   : > { %v200_v10 = vld [vmem:[%s197_s7] sm:$0xff] }
  0x1b   : > { %v217_v15 = vrot.slane %v200_v10, %v216_v8  ;;  %v221_v16 = vrot.slane %v200_v10, %v220_v9  ;;  %v243_v17 = vrot.slane %v200_v10, %v242_v11  ;;  %v247_v18 = vrot.slane %v200_v10, %v246_v12  ;;  %p499_p5 = pnand %p498_p3, %p492_p0 }
  0x1c   : > { %v269_v19 = vrot.slane %v200_v10, %v268_v13  ;;  %v273_v20 = vrot.slane %v200_v10, %v272_v14  ;;  %v295_v31 = vrot.slane %v200_v10, %v294_v21  ;;  %v299_v32 = vrot.slane %v200_v10, %v298_v22 }
  0x1d   : > { %v227_v23 = vrot.slane %v217_v15, %v216_v8  ;;  %v231_v24 = vrot.slane %v221_v16, %v216_v8  ;;  %v253_v27 = vrot.slane %v243_v17, %v242_v11  ;;  %v257_v28 = vrot.slane %v247_v18, %v242_v11 }
  0x1e   : > { %v279_v29 = vrot.slane %v269_v19, %v268_v13  ;;  %v283_v30 = vrot.slane %v273_v20, %v268_v13  ;;  %v305_v43 = vrot.slane %v295_v31, %v294_v21  ;;  %v309_v44 = vrot.slane %v299_v32, %v294_v21 }
  0x8f   : > { %v211_v25 = vpop.permute.xlu0 %210  ;;  %v238_v26 = vpop.permute.xlu1 %237 }
  0x90   : > { %v232_v33 = vmul.f32 %v227_v23, %v211_v25  ;;  %v233_v34 = vmul.f32 %v231_v24, %v211_v25  ;;  %v258_v36 = vmul.f32 %v253_v27, %v238_v26  ;;  %v259_v37 = vmul.f32 %v257_v28, %v238_v26 }
  0x93   : > { %v206_v35 = vpop.permute.xlu0 %205 }
  0x94   : > { %v234_v38 = vadd.f32 %v232_v33, %v206_v35  ;;  %v235_v39 = vadd.f32 %v233_v34, %v206_v35  ;;  %v264_v40 = vpop.permute.xlu1 %263 }
  0x95   : > { %v284_v41 = vmul.f32 %v279_v29, %v264_v40  ;;  %v285_v42 = vmul.f32 %v283_v30, %v264_v40 }
  0x96   : > { %v260_v45 = vadd.f32 %v258_v36, %v234_v38  ;;  %v261_v46 = vadd.f32 %v259_v37, %v235_v39 }
  0x98   : > { %v286_v47 = vadd.f32 %v284_v41, %v260_v45  ;;  %v287_v48 = vadd.f32 %v285_v42, %v261_v46  ;;  %v290_v49 = vpop.permute.xlu0 %289 }
  0x99   : > { %v310_v50 = vmul.f32 %v305_v43, %v290_v49  ;;  %v311_v51 = vmul.f32 %v309_v44, %v290_v49 }
  0x9b   : > { %v312_v52 = vadd.f32 %v310_v50, %v286_v47  ;;  %v313_v53 = vadd.f32 %v311_v51, %v287_v48 }
  0x9d   : > { %v314_v54 = vmax.f32 %v312_v52, 0.0  ;;  %v315_v55 = vmax.f32 %v313_v53, 0.0 }
  0x9f   : > { %316 = vst [vmem:[%s188_s11] sm:$0xff] %v314_v54  ;;  %317 = vst [vmem:[%s188_s11 + $0x8] sm:$0xff] %v315_v55 }
  0xa0   : > { %502 = shalt.err (!%p499_p5)
}
  0xa1   : > { %s503_s30 = scalar_lea.hbm %s667_s23, 256  ;;  %s507_s6 = scalar_lea.hbm %s719_s3, 512 }
  0xa2   : > { %p504_p6 = scmp.ne.s32.totalorder %s667_s23, %s503_s30  ;;  %p508_p10 = scmp.lt.u32.totalorder %s667_s23, %s719_s3 }
  0xa3   : > { %p509_p11 = scmp.lt.u32.totalorder %s507_s6, %s503_s30  ;;  %p511_p13 = scmp.lt.u32.totalorder %s503_s30, %s667_s23 }
  0xa4   : > { %p505_p7 = pnand %p504_p6, %p634_p4 }
  0xa5   : > { %p510_p12 = por %p509_p11, %p508_p10 }
  0xa6   : > { %p506_p9 = pneg %p505_p7 }
  0xa7   : > { %p512_p0 = por %p511_p13, %p510_p12 }
  0xa9   : > { %p513_p1 = pnand %p512_p0, %p506_p9 }
  0xab   : > { %516 = shalt.err (!%p513_p1)
}
  0xac   : > { %426 = dma.vmem_to_hbm [thread:$0]  (%p634_p4), %s669_s18, 256, %s667_s23, %s319_s15  }
  0xad PF: > { %p432_p2 = scmp.ge.s32.totalorder %s567_s17, 2  ;;  %s347_s9 = sand.u32 1, %s547_s12  }
  0xae   : > { %s348_s10 = scalar_lea.sflag [#allocation3], %s347_s9 }
  0xaf   : > { %p429_p3 = pnand %p432_p2, %p641_p8 }
  0xb1   : > { %542 = dma.done.wait (!%p429_p3), %s348_s10, 256  }
  0xb2   : > { %544 = vsyncadd (!%p429_p3), %s348_s10, 4294967040  ;;  %s16_s17 = sadd.s32 1, %s567_s17   ;;  %s722_s12 = smov %s551_s13 }
  0xb3   : > { %p13_p5 = scmp.ge.s32.totalorder %s16_s17, 4   ;;  %s723_s13 = smov %s555_s14 }
  0xb4   : > { %s724_s14 = smov %s647_s25  ;;  %s725_s15 = smov %s563_s16 }
  0xb5   : > { %s726_s16 = smov %s728_s20  ;;  %15 = sbr.rel (!%p13_p5) target bundleno = 4 (0x4), region = 67 }
  0xbc   :  { %353 = vsyncpa [#allocation3], 1 }
  0xbd   :  { %355 = vsyncpa [#allocation3 + $0x1], 1 }

</bundles_post_ra>
